<compile_context>
chip_gen: v7x
topology: tpu7x:2x2x1
jax: 0.10.0
libtpu: 0.0.40
codegen_flags: <defaults>
</compile_context>

<pallas_src>
import jax
import jax.numpy as jnp
from jax.experimental import pallas as pl
from jax.experimental.pallas import tpu as pltpu


def _round_up(x, m):
    return (x + m - 1) // m * m


def _vmem_capacity_bytes():
    try:
        return int(pltpu.get_tpu_info().vmem_capacity_bytes)
    except Exception:
        return 64 << 20  # safe lower bound for every generation (v7x)


def _pick_tile_c(h_pad, c_pad128, budget):
    """Keep w2 resident when cheap; otherwise stream lane-dense 512-wide
    column tiles (2x the v6e/v7x 256-wide MXU)."""
    if h_pad * c_pad128 * 2 <= budget // 4:
        return c_pad128
    return 512


def _pick_tile_b(batch, d_pad, h_pad, c_pad, tile_c, budget):
    resident = d_pad * h_pad * 2 + h_pad * 4                 # w1 (1 buf) + b1
    streamed_w = 2 * (h_pad * tile_c * 2 + 2 * tile_c * 4)   # w2/b2/mask (2 buf)
    per_row = (2 * d_pad * 2                                 # x bf16 (2 buf)
               + 2 * c_pad * 4                               # out f32 (2 buf)
               + h_pad * 4)                                  # h scratch f32
    avail = budget - resident - streamed_w
    if avail <= per_row * 16:
        # TODO(synk): resident w1 alone nearly fills VMEM; needs D/H chunking path.
        avail = per_row * 16
    tile = avail // per_row
    tile = min(tile, 1024)                                   # HBM-bound past this
    tile = min(tile, _round_up(-(-batch // 2), 128))         # >=2 batch steps when B large
    tile = min(tile, _round_up(batch, 16))                   # don't over-pad tiny B
    if tile >= 128:
        tile = (tile // 128) * 128
    else:
        tile = max(16, (tile // 16) * 16)
    return int(tile)


def _make_kernel(tile_c, n_c_tiles):
    """Fused combiner-FC(ReLU) + decoder + softmax. Grid = (batch tiles, C tiles)."""

    def kernel(x_ref, w1_ref, b1_ref, w2_ref, b2_ref, mask_ref, out_ref, h_sc):
        j = pl.program_id(1)

        # --- combiner: Dense(D_pad -> H_pad) + ReLU, once per batch tile ----
        @pl.when(j == 0)
        def _():
            h = jnp.dot(x_ref[...], w1_ref[...],
                        preferred_element_type=jnp.float32)
            h_sc[...] = jnp.maximum(h + b1_ref[...], jnp.float32(0.0))

        # --- decoder tile: logits[:, j*tile_c : (j+1)*tile_c] ----------------
        lg = jnp.dot(h_sc[...].astype(jnp.bfloat16), w2_ref[...],
                     preferred_element_type=jnp.float32)
        lg = lg + b2_ref[...] + mask_ref[...]   # additive -inf bias on padded classes

        if n_c_tiles == 1:
            # --- predictions: numerically-stable softmax, exact divide -------
            m = jnp.max(lg, axis=-1, keepdims=True)
            e = jnp.exp(lg - m)
            out_ref[...] = e / jnp.sum(e, axis=-1, keepdims=True)
        else:
            # stage logit tile in the resident f32 output block
            col0 = pl.multiple_of(j * tile_c, tile_c)
            out_ref[:, pl.ds(col0, tile_c)] = lg

            @pl.when(j == n_c_tiles - 1)
            def _():
                logits = out_ref[...]
                m = jnp.max(logits, axis=-1, keepdims=True)
                e = jnp.exp(logits - m)
                out_ref[...] = e / jnp.sum(e, axis=-1, keepdims=True)

    return kernel


def _forward_impl(encoder_outputs, params, single_buffer_weights):
    B = int(encoder_outputs[0].shape[0])
    d_ins = [int(e.shape[1]) for e in encoder_outputs]
    D = sum(d_ins)

    w1, b1 = params["combiner_w"], params["combiner_b"]
    w2, b2 = params["decoder_w"], params["decoder_b"]
    H = int(w1.shape[1])
    C = int(w2.shape[1])

    D_pad = _round_up(D, 128)
    H_pad = _round_up(H, 128)
    C_pad128 = _round_up(C, 128)

    cap = _vmem_capacity_bytes()
    budget = int(cap * 0.7)

    tile_c = _pick_tile_c(H_pad, C_pad128, budget)
    C_pad = _round_up(C, tile_c)
    n_c = C_pad // tile_c

    tile_b = _pick_tile_b(B, D_pad, H_pad, C_pad, tile_c, budget)
    B_pad = _round_up(B, tile_b)
    n_b = B_pad // tile_b

    # --- pack all encoder outputs into ONE lane-dense bf16 operand -----------
    x = jnp.concatenate([e.astype(jnp.bfloat16) for e in encoder_outputs], axis=-1)
    x = jnp.pad(x, ((0, B_pad - B), (0, D_pad - D)))

    w1p = jnp.pad(w1, ((0, D_pad - D), (0, H_pad - H))).astype(jnp.bfloat16)
    b1p = jnp.pad(jnp.reshape(b1, (1, H)), ((0, 0), (0, H_pad - H))).astype(jnp.float32)
    w2p = jnp.pad(w2, ((0, H_pad - H), (0, C_pad - C))).astype(jnp.bfloat16)
    b2p = jnp.pad(jnp.reshape(b2, (1, C)), ((0, 0), (0, C_pad - C))).astype(jnp.float32)
    # additive class mask: 0 for real classes, -1e30 for padded class columns
    mask = jnp.where(jnp.arange(C_pad)[None, :] < C,
                     jnp.float32(0.0), jnp.float32(-1e30))

    def const_spec(shape):
        if single_buffer_weights:
            return pl.BlockSpec(shape, lambda i, j: (0, 0),
                                pipeline_mode=pl.Buffered(1))
        return pl.BlockSpec(shape, lambda i, j: (0, 0))

    def ctile_spec(shape):
        if n_c == 1:
            return const_spec(shape)
        return pl.BlockSpec(shape, lambda i, j: (0, j))

    in_specs = [
        pl.BlockSpec((tile_b, D_pad), lambda i, j: (i, 0)),   # packed encoder outputs
        const_spec((D_pad, H_pad)),                           # w1 (resident)
        const_spec((1, H_pad)),                               # b1 (resident)
        ctile_spec((H_pad, tile_c)),                          # w2 (resident or streamed)
        ctile_spec((1, tile_c)),                              # b2
        ctile_spec((1, tile_c)),                              # class mask
    ]
    out_specs = pl.BlockSpec((tile_b, C_pad), lambda i, j: (i, 0))

    vmem_need = (D_pad * H_pad * 2 + H_pad * 4
                 + 2 * (H_pad * tile_c * 2 + 2 * tile_c * 4)
                 + tile_b * (2 * D_pad * 2 + 2 * C_pad * 4 + H_pad * 4))
    vmem_limit = int(min(max(2 * vmem_need, 32 << 20), int(0.92 * cap)))

    cost = pl.CostEstimate(
        flops=2 * B_pad * (D_pad * H_pad + H_pad * C_pad),
        transcendentals=B_pad * C_pad,
        bytes_accessed=(B_pad * D_pad * 2 + D_pad * H_pad * 2
                        + n_b * H_pad * C_pad * 2
                        + (H_pad + 2 * C_pad) * 4
                        + B_pad * C_pad * 4),
    )

    out = pl.pallas_call(
        _make_kernel(tile_c, n_c),
        out_shape=jax.ShapeDtypeStruct((B_pad, C_pad), jnp.float32),
        grid=(n_b, n_c),
        in_specs=in_specs,
        out_specs=out_specs,
        scratch_shapes=[pltpu.VMEM((tile_b, H_pad), jnp.float32)],
        compiler_params=pltpu.CompilerParams(
            dimension_semantics=("parallel", "arbitrary"),
            vmem_limit_bytes=vmem_limit,
        ),
        cost_estimate=cost,
    )(x, w1p, b1p, w2p, b2p, mask)

    out = jax.block_until_ready(out)
    # strip batch padding and padded class columns
    return out[:B, :C]


def wrapper_module_forward(encoder_outputs, params):
    """Equivalent of WrapperModule.forward(*encoder_outputs).

    encoder_outputs: list of [B, D_i] arrays (one per input feature, ordered like
                     ECD.input_features.keys()).
    params: combiner (concat + Dense/ReLU) and category-decoder weights.
    Returns: softmax probabilities for the target output feature, [B, num_classes].
    """
    try:
        return _forward_impl(encoder_outputs, params, single_buffer_weights=True)
    except Exception:
        # Fallback if pl.Buffered(1) single-buffering is rejected by this jax version.
        return _forward_impl(encoder_outputs, params, single_buffer_weights=False)


def init_params(key, d_in, hidden, num_classes):
    k1, k2, k3, k4 = jax.random.split(key, 4)
    scale1 = 1.0 / jnp.sqrt(jnp.float32(d_in))
    scale2 = 1.0 / jnp.sqrt(jnp.float32(hidden))
    return {
        "combiner_w": jax.random.normal(k1, (d_in, hidden), jnp.float32) * scale1,
        "combiner_b": jax.random.normal(k2, (1, hidden), jnp.float32) * 0.01,
        "decoder_w": jax.random.normal(k3, (hidden, num_classes), jnp.float32) * scale2,
        "decoder_b": jax.random.normal(k4, (1, num_classes), jnp.float32) * 0.01,
    }


if __name__ == "__main__":
    # Small synthetic shapes: 2 input features with encoder outputs of width 32,
    # batch=8, combiner hidden=64, category target feature with 8 classes.
    B, D1, D2, H, C = 8, 32, 32, 64, 8

    key = jax.random.PRNGKey(0)
    k_in1, k_in2, k_params = jax.random.split(key, 3)

    enc_out_1 = jax.random.normal(k_in1, (B, D1), jnp.float32)   # input feature 1
    enc_out_2 = jax.random.normal(k_in2, (B, D2), jnp.float32)   # input feature 2
    params = init_params(k_params, D1 + D2, H, C)

    probs = wrapper_module_forward([enc_out_1, enc_out_2], params)
    probs = jax.block_until_ready(probs)

    # Reference in plain JAX with the same bf16 operand casts the kernel uses.
    def bf(a):
        return a.astype(jnp.bfloat16)

    x_cat = jnp.concatenate([enc_out_1, enc_out_2], axis=-1)
    h_ref = jnp.maximum(
        jnp.dot(bf(x_cat), bf(params["combiner_w"]),
                preferred_element_type=jnp.float32) + params["combiner_b"], 0.0)
    logits_ref = jnp.dot(bf(h_ref), bf(params["decoder_w"]),
                         preferred_element_type=jnp.float32) + params["decoder_b"]
    probs_ref = jax.nn.softmax(logits_ref, axis=-1)

    assert probs.shape == (B, C)
    assert jnp.allclose(probs, probs_ref, atol=2e-3, rtol=2e-3), (
        float(jnp.max(jnp.abs(probs - probs_ref))))
    assert jnp.allclose(jnp.sum(probs, axis=-1), 1.0, atol=1e-3)

    print("KERNEL_OK")
</pallas_src>

<mosaic_0001>
module attributes {stable_mosaic.version = 11 : i64} {
  func.func @kernel(%arg0: i32, %arg1: i32, %arg2: memref<16x128xbf16, #tpu.memory_space<vmem>>, %arg3: memref<128x128xbf16, #tpu.memory_space<vmem>>, %arg4: memref<1x128xf32, #tpu.memory_space<vmem>>, %arg5: memref<128x128xbf16, #tpu.memory_space<vmem>>, %arg6: memref<1x128xf32, #tpu.memory_space<vmem>>, %arg7: memref<1x128xf32, #tpu.memory_space<vmem>>, %arg8: memref<16x128xf32, #tpu.memory_space<vmem>>, %arg9: memref<16x128xf32, #tpu.memory_space<vmem>>) attributes {dimension_semantics = [#tpu.dimension_semantics<parallel>, #tpu.dimension_semantics<arbitrary>], iteration_bounds = array<i64: 1, 1>, scalar_prefetch = 0 : i64, scratch_operands = 1 : i64, tpu.core_type = #tpu.core_type<tc>, window_params = [{transform_indices = @transform_0, window_bounds = array<i64: 16, 128>}, {pipeline_mode = #tpu.pipeline_mode<synchronous>, transform_indices = @transform_1, window_bounds = array<i64: 128, 128>}, {pipeline_mode = #tpu.pipeline_mode<synchronous>, transform_indices = @transform_2, window_bounds = array<i64: 1, 128>}, {pipeline_mode = #tpu.pipeline_mode<synchronous>, transform_indices = @transform_3, window_bounds = array<i64: 128, 128>}, {pipeline_mode = #tpu.pipeline_mode<synchronous>, transform_indices = @transform_4, window_bounds = array<i64: 1, 128>}, {pipeline_mode = #tpu.pipeline_mode<synchronous>, transform_indices = @transform_5, window_bounds = array<i64: 1, 128>}, {transform_indices = @transform_6, window_bounds = array<i64: 16, 128>}]} {
    %c0_i32 = arith.constant 0 : i32
    %0 = arith.cmpi eq, %arg1, %c0_i32 : i32
    %1 = arith.extui %0 : i1 to i32
    %c0_i32_0 = arith.constant 0 : i32
    %2 = arith.cmpi ne, %1, %c0_i32_0 : i32
    scf.if %2 {
      %c0_12 = arith.constant 0 : index
      %c0_13 = arith.constant 0 : index
      %23 = vector.load %arg2[%c0_12, %c0_13] : memref<16x128xbf16, #tpu.memory_space<vmem>>, vector<16x128xbf16>
      %c0_14 = arith.constant 0 : index
      %c0_15 = arith.constant 0 : index
      %24 = vector.load %arg3[%c0_14, %c0_15] : memref<128x128xbf16, #tpu.memory_space<vmem>>, vector<128x128xbf16>
      %cst_16 = arith.constant dense<0.000000e+00> : vector<16x128xf32>
      %25 = tpu.matmul %23, %24, %cst_16 {dimension_numbers = #tpu.dot_dimension_numbers<[1], [0], [0], [1], [0, 0, 1, 1], [], []>} : vector<16x128xbf16>, vector<128x128xbf16>, vector<16x128xf32> -> vector<16x128xf32>
      %c0_17 = arith.constant 0 : index
      %c0_18 = arith.constant 0 : index
      %26 = vector.load %arg4[%c0_17, %c0_18] : memref<1x128xf32, #tpu.memory_space<vmem>>, vector<1x128xf32>
      %27 = vector.broadcast %26 : vector<1x128xf32> to vector<16x128xf32>
      %28 = arith.addf %25, %27 : vector<16x128xf32>
      %cst_19 = arith.constant 0.000000e+00 : f32
      %29 = vector.broadcast %cst_19 : f32 to vector<16x128xf32>
      %30 = arith.maximumf %28, %29 : vector<16x128xf32>
      %c0_20 = arith.constant 0 : index
      %c0_21 = arith.constant 0 : index
      %31 = vector.load %arg9[%c0_20, %c0_21] : memref<16x128xf32, #tpu.memory_space<vmem>>, vector<16x128xf32>
      tpu.vector_store %arg9[%c0_20, %c0_21], %30 {strides = array<i32>} : memref<16x128xf32, #tpu.memory_space<vmem>>, vector<16x128xf32>,
    } else {
    }
    %c0 = arith.constant 0 : index
    %c0_1 = arith.constant 0 : index
    %3 = vector.load %arg9[%c0, %c0_1] : memref<16x128xf32, #tpu.memory_space<vmem>>, vector<16x128xf32>
    %4 = arith.truncf %3 : vector<16x128xf32> to vector<16x128xbf16>
    %c0_2 = arith.constant 0 : index
    %c0_3 = arith.constant 0 : index
    %5 = vector.load %arg5[%c0_2, %c0_3] : memref<128x128xbf16, #tpu.memory_space<vmem>>, vector<128x128xbf16>
    %cst = arith.constant dense<0.000000e+00> : vector<16x128xf32>
    %6 = tpu.matmul %4, %5, %cst {dimension_numbers = #tpu.dot_dimension_numbers<[1], [0], [0], [1], [0, 0, 1, 1], [], []>} : vector<16x128xbf16>, vector<128x128xbf16>, vector<16x128xf32> -> vector<16x128xf32>
    %c0_4 = arith.constant 0 : index
    %c0_5 = arith.constant 0 : index
    %7 = vector.load %arg6[%c0_4, %c0_5] : memref<1x128xf32, #tpu.memory_space<vmem>>, vector<1x128xf32>
    %8 = vector.broadcast %7 : vector<1x128xf32> to vector<16x128xf32>
    %9 = arith.addf %6, %8 : vector<16x128xf32>
    %c0_6 = arith.constant 0 : index
    %c0_7 = arith.constant 0 : index
    %10 = vector.load %arg7[%c0_6, %c0_7] : memref<1x128xf32, #tpu.memory_space<vmem>>, vector<1x128xf32>
    %11 = vector.broadcast %10 : vector<1x128xf32> to vector<16x128xf32>
    %12 = arith.addf %9, %11 : vector<16x128xf32>
    %cst_8 = arith.constant dense<0xFF800000> : vector<16xf32>
    %13 = vector.multi_reduction <maximumf>, %12, %cst_8 [1] : vector<16x128xf32> to vector<16xf32>
    %14 = vector.shape_cast %13 : vector<16xf32> to vector<16x1xf32>
    %15 = vector.broadcast %14 : vector<16x1xf32> to vector<16x128xf32>
    %16 = arith.subf %12, %15 : vector<16x128xf32>
    %17 = math.exp %16 : vector<16x128xf32>
    %cst_9 = arith.constant dense<0.000000e+00> : vector<16xf32>
    %18 = vector.multi_reduction <add>, %17, %cst_9 [1] : vector<16x128xf32> to vector<16xf32>
    %19 = vector.shape_cast %18 : vector<16xf32> to vector<16x1xf32>
    %20 = vector.broadcast %19 : vector<16x1xf32> to vector<16x128xf32>
    %21 = arith.divf %17, %20 : vector<16x128xf32>
    %c0_10 = arith.constant 0 : index
    %c0_11 = arith.constant 0 : index
    %22 = vector.load %arg8[%c0_10, %c0_11] : memref<16x128xf32, #tpu.memory_space<vmem>>, vector<16x128xf32>
    tpu.vector_store %arg8[%c0_10, %c0_11], %21 {strides = array<i32>} : memref<16x128xf32, #tpu.memory_space<vmem>>, vector<16x128xf32>,
    return
  }
  func.func @transform_0(%arg0: i32, %arg1: i32) -> (i32, i32) {
    %c0_i32 = arith.constant 0 : i32
    %c0_i32_0 = arith.constant 0 : i32
    return %arg0, %c0_i32 : i32, i32
  }
  func.func @transform_1(%arg0: i32, %arg1: i32) -> (i32, i32) {
    %c0_i32 = arith.constant 0 : i32
    %c0_i32_0 = arith.constant 0 : i32
    %c0_i32_1 = arith.constant 0 : i32
    return %c0_i32, %c0_i32_0 : i32, i32
  }
  func.func @transform_2(%arg0: i32, %arg1: i32) -> (i32, i32) {
    %c0_i32 = arith.constant 0 : i32
    %c0_i32_0 = arith.constant 0 : i32
    %c0_i32_1 = arith.constant 0 : i32
    return %c0_i32, %c0_i32_0 : i32, i32
  }
  func.func @transform_3(%arg0: i32, %arg1: i32) -> (i32, i32) {
    %c0_i32 = arith.constant 0 : i32
    %c0_i32_0 = arith.constant 0 : i32
    %c0_i32_1 = arith.constant 0 : i32
    return %c0_i32, %c0_i32_0 : i32, i32
  }
  func.func @transform_4(%arg0: i32, %arg1: i32) -> (i32, i32) {
    %c0_i32 = arith.constant 0 : i32
    %c0_i32_0 = arith.constant 0 : i32
    %c0_i32_1 = arith.constant 0 : i32
    return %c0_i32, %c0_i32_0 : i32, i32
  }
  func.func @transform_5(%arg0: i32, %arg1: i32) -> (i32, i32) {
    %c0_i32 = arith.constant 0 : i32
    %c0_i32_0 = arith.constant 0 : i32
    %c0_i32_1 = arith.constant 0 : i32
    return %c0_i32, %c0_i32_0 : i32, i32
  }
  func.func @transform_6(%arg0: i32, %arg1: i32) -> (i32, i32) {
    %c0_i32 = arith.constant 0 : i32
    %c0_i32_0 = arith.constant 0 : i32
    return %arg0, %c0_i32 : i32, i32
  }
}

module attributes {stable_mosaic.version = 11 : i64} {
  func.func @kernel(%arg0: i32, %arg1: i32, %arg2: memref<16x128xbf16, #tpu.memory_space<vmem>>, %arg3: memref<128x128xbf16, #tpu.memory_space<vmem>>, %arg4: memref<1x128xf32, #tpu.memory_space<vmem>>, %arg5: memref<128x128xbf16, #tpu.memory_space<vmem>>, %arg6: memref<1x128xf32, #tpu.memory_space<vmem>>, %arg7: memref<1x128xf32, #tpu.memory_space<vmem>>, %arg8: memref<16x128xf32, #tpu.memory_space<vmem>>, %arg9: memref<16x128xf32, #tpu.memory_space<vmem>>) attributes {dimension_semantics = [#tpu.dimension_semantics<parallel>, #tpu.dimension_semantics<arbitrary>], iteration_bounds = array<i64: 1, 1>, scalar_prefetch = 0 : i64, scratch_operands = 1 : i64, tpu.core_type = #tpu.core_type<tc>, window_params = [{transform_indices = @transform_0, window_bounds = array<i64: 16, 128>}, {pipeline_mode = #tpu.pipeline_mode<synchronous>, transform_indices = @transform_1, window_bounds = array<i64: 128, 128>}, {pipeline_mode = #tpu.pipeline_mode<synchronous>, transform_indices = @transform_2, window_bounds = array<i64: 1, 128>}, {pipeline_mode = #tpu.pipeline_mode<synchronous>, transform_indices = @transform_3, window_bounds = array<i64: 128, 128>}, {pipeline_mode = #tpu.pipeline_mode<synchronous>, transform_indices = @transform_4, window_bounds = array<i64: 1, 128>}, {pipeline_mode = #tpu.pipeline_mode<synchronous>, transform_indices = @transform_5, window_bounds = array<i64: 1, 128>}, {transform_indices = @transform_6, window_bounds = array<i64: 16, 128>}]} {
    %c0_i32 = arith.constant 0 : i32
    %0 = arith.cmpi eq, %arg1, %c0_i32 : i32
    %1 = arith.extui %0 : i1 to i32
    %c0_i32_0 = arith.constant 0 : i32
    %2 = arith.cmpi ne, %1, %c0_i32_0 : i32
    scf.if %2 {
      %c0_12 = arith.constant 0 : index
      %c0_13 = arith.constant 0 : index
      %23 = vector.load %arg2[%c0_12, %c0_13] : memref<16x128xbf16, #tpu.memory_space<vmem>>, vector<16x128xbf16>
      %c0_14 = arith.constant 0 : index
      %c0_15 = arith.constant 0 : index
      %24 = vector.load %arg3[%c0_14, %c0_15] : memref<128x128xbf16, #tpu.memory_space<vmem>>, vector<128x128xbf16>
      %cst_16 = arith.constant dense<0.000000e+00> : vector<16x128xf32>
      %25 = tpu.matmul %23, %24, %cst_16 {dimension_numbers = #tpu.dot_dimension_numbers<[1], [0], [0], [1], [0, 0, 1, 1], [], []>} : vector<16x128xbf16>, vector<128x128xbf16>, vector<16x128xf32> -> vector<16x128xf32>
      %c0_17 = arith.constant 0 : index
      %c0_18 = arith.constant 0 : index
      %26 = vector.load %arg4[%c0_17, %c0_18] : memref<1x128xf32, #tpu.memory_space<vmem>>, vector<1x128xf32>
      %27 = vector.broadcast %26 : vector<1x128xf32> to vector<16x128xf32>
      %28 = arith.addf %25, %27 : vector<16x128xf32>
      %cst_19 = arith.constant 0.000000e+00 : f32
      %29 = vector.broadcast %cst_19 : f32 to vector<16x128xf32>
      %30 = arith.maximumf %28, %29 : vector<16x128xf32>
      %c0_20 = arith.constant 0 : index
      %c0_21 = arith.constant 0 : index
      %31 = vector.load %arg9[%c0_20, %c0_21] : memref<16x128xf32, #tpu.memory_space<vmem>>, vector<16x128xf32>
      tpu.vector_store %arg9[%c0_20, %c0_21], %30 {strides = array<i32>} : memref<16x128xf32, #tpu.memory_space<vmem>>, vector<16x128xf32>,
    } else {
    }
    %c0 = arith.constant 0 : index
    %c0_1 = arith.constant 0 : index
    %3 = vector.load %arg9[%c0, %c0_1] : memref<16x128xf32, #tpu.memory_space<vmem>>, vector<16x128xf32>
    %4 = arith.truncf %3 : vector<16x128xf32> to vector<16x128xbf16>
    %c0_2 = arith.constant 0 : index
    %c0_3 = arith.constant 0 : index
    %5 = vector.load %arg5[%c0_2, %c0_3] : memref<128x128xbf16, #tpu.memory_space<vmem>>, vector<128x128xbf16>
    %cst = arith.constant dense<0.000000e+00> : vector<16x128xf32>
    %6 = tpu.matmul %4, %5, %cst {dimension_numbers = #tpu.dot_dimension_numbers<[1], [0], [0], [1], [0, 0, 1, 1], [], []>} : vector<16x128xbf16>, vector<128x128xbf16>, vector<16x128xf32> -> vector<16x128xf32>
    %c0_4 = arith.constant 0 : index
    %c0_5 = arith.constant 0 : index
    %7 = vector.load %arg6[%c0_4, %c0_5] : memref<1x128xf32, #tpu.memory_space<vmem>>, vector<1x128xf32>
    %8 = vector.broadcast %7 : vector<1x128xf32> to vector<16x128xf32>
    %9 = arith.addf %6, %8 : vector<16x128xf32>
    %c0_6 = arith.constant 0 : index
    %c0_7 = arith.constant 0 : index
    %10 = vector.load %arg7[%c0_6, %c0_7] : memref<1x128xf32, #tpu.memory_space<vmem>>, vector<1x128xf32>
    %11 = vector.broadcast %10 : vector<1x128xf32> to vector<16x128xf32>
    %12 = arith.addf %9, %11 : vector<16x128xf32>
    %cst_8 = arith.constant dense<0xFF800000> : vector<16xf32>
    %13 = vector.multi_reduction <maximumf>, %12, %cst_8 [1] : vector<16x128xf32> to vector<16xf32>
    %14 = vector.shape_cast %13 : vector<16xf32> to vector<16x1xf32>
    %15 = vector.broadcast %14 : vector<16x1xf32> to vector<16x128xf32>
    %16 = arith.subf %12, %15 : vector<16x128xf32>
    %17 = math.exp %16 : vector<16x128xf32>
    %cst_9 = arith.constant dense<0.000000e+00> : vector<16xf32>
    %18 = vector.multi_reduction <add>, %17, %cst_9 [1] : vector<16x128xf32> to vector<16xf32>
    %19 = vector.shape_cast %18 : vector<16xf32> to vector<16x1xf32>
    %20 = vector.broadcast %19 : vector<16x1xf32> to vector<16x128xf32>
    %21 = arith.divf %17, %20 : vector<16x128xf32>
    %c0_10 = arith.constant 0 : index
    %c0_11 = arith.constant 0 : index
    %22 = vector.load %arg8[%c0_10, %c0_11] : memref<16x128xf32, #tpu.memory_space<vmem>>, vector<16x128xf32>
    tpu.vector_store %arg8[%c0_10, %c0_11], %21 {strides = array<i32>} : memref<16x128xf32, #tpu.memory_space<vmem>>, vector<16x128xf32>,
    return
  }
  func.func @transform_0(%arg0: i32, %arg1: i32) -> (i32, i32) {
    %c0_i32 = arith.constant 0 : i32
    %c0_i32_0 = arith.constant 0 : i32
    return %arg0, %c0_i32 : i32, i32
  }
  func.func @transform_1(%arg0: i32, %arg1: i32) -> (i32, i32) {
    %c0_i32 = arith.constant 0 : i32
    %c0_i32_0 = arith.constant 0 : i32
    %c0_i32_1 = arith.constant 0 : i32
    return %c0_i32, %c0_i32_0 : i32, i32
  }
  func.func @transform_2(%arg0: i32, %arg1: i32) -> (i32, i32) {
    %c0_i32 = arith.constant 0 : i32
    %c0_i32_0 = arith.constant 0 : i32
    %c0_i32_1 = arith.constant 0 : i32
    return %c0_i32, %c0_i32_0 : i32, i32
  }
  func.func @transform_3(%arg0: i32, %arg1: i32) -> (i32, i32) {
    %c0_i32 = arith.constant 0 : i32
    %c0_i32_0 = arith.constant 0 : i32
    %c0_i32_1 = arith.constant 0 : i32
    return %c0_i32, %c0_i32_0 : i32, i32
  }
  func.func @transform_4(%arg0: i32, %arg1: i32) -> (i32, i32) {
    %c0_i32 = arith.constant 0 : i32
    %c0_i32_0 = arith.constant 0 : i32
    %c0_i32_1 = arith.constant 0 : i32
    return %c0_i32, %c0_i32_0 : i32, i32
  }
  func.func @transform_5(%arg0: i32, %arg1: i32) -> (i32, i32) {
    %c0_i32 = arith.constant 0 : i32
    %c0_i32_0 = arith.constant 0 : i32
    %c0_i32_1 = arith.constant 0 : i32
    return %c0_i32, %c0_i32_0 : i32, i32
  }
  func.func @transform_6(%arg0: i32, %arg1: i32) -> (i32, i32) {
    %c0_i32 = arith.constant 0 : i32
    %c0_i32_0 = arith.constant 0 : i32
    return %arg0, %c0_i32 : i32, i32
  }
}

</mosaic_0001>

<bundles_post_ra>
// kernel: tpu_custom_call.1
= control target key start
LH: loop header
LB: loop body
LE: loop exit
PB: predicated region body
PF: predicated region fallthrough
CT: control target
= control target key end

     0   :  { %11 = vsyncpa [#allocation4], 0  ;;  %s681_s0 = inlined_call_operand.hbm [shape: bf16[16,128], index: 0, kind: input, shape index: {}]   ;;  %s682_s1 = inlined_call_operand.hbm [shape: bf16[128,128], index: 1, kind: input, shape index: {}]   ;;  %s683_s2 = inlined_call_operand.vmem [shape: f32[1,128], index: 2, kind: input, shape index: {}]   ;;  %s684_s3 = inlined_call_operand.hbm [shape: bf16[128,128], index: 3, kind: input, shape index: {}]   ;;  %s685_s4 = inlined_call_operand.vmem [shape: f32[1,128], index: 4, kind: input, shape index: {}]   ;;  %s686_s5 = inlined_call_operand.vmem [shape: f32[1,128], index: 5, kind: input, shape index: {}]   ;;  %s687_s6 = inlined_call_operand.hbm [shape: f32[16,128], index: 6, kind: output, shape index: {}]  }
   0x1   :  { %12 = vsyncpa [#allocation7], 0 }
   0x2   :  { %13 = vsyncpa [#allocation5], 0  ;;  %s563_s21 = smov [#allocation6]   ;;  %s564_s23 = smov [#allocation3]  }
   0x3   :  { %s31_s22 = sshll.u32 %s563_s21, 4  ;;  %s19_s24 = sshll.u32 %s564_s23, 4  ;;  %s32_s22 = int_to_ptr.vmem [resolvable:$true] %s31_s22  ;;  %s608_s24 = int_to_ptr.vmem [resolvable:$true] %s19_s24 }
   0x4   :  { %s469_s27 = scalar_lea.hbm %s682_s1, 1024 }
   0x5   :  { %p470_p0 = scmp.ne.s32.totalorder %s682_s1, %s469_s27  ;;  %p473_p1 = scmp.lt.u32.totalorder %s469_s27, %s682_s1 }
   0x7   :  { %p475_p2 = pnand %p473_p1, %p470_p0 }
   0x9   :  { %478 = shalt.err (!%p475_p2)
}
   0xa   :  { %s479_s8 = scalar_lea.vmem %s32_s22, 1024  ;;  %p484_p4 = scmp.lt.s32.totalorder %s32_s22, %s32_s22 }
   0xb   :  { %p480_p3 = scmp.ne.s32.totalorder %s32_s22, %s479_s8  ;;  %p485_p5 = scmp.lt.s32.totalorder %s479_s8, %s479_s8 }
   0xd   :  { %p486_p6 = por %p485_p5, %p484_p4 }
   0xf   :  { %p487_p7 = pnand %p486_p6, %p480_p3 }
  0x11   :  { %490 = shalt.err (!%p487_p7)
}
  0x12   :  { %s565_s9 = smov 64   ;;  %s566_s10 = smov 4  }
  0x13   :  { %37 = dma.hbm_to_vmem [thread:$0]  %s682_s1, 1024, %s32_s22, [#allocation7], %s565_s9, %s565_s9, %s566_s10  }
  0x14   :  { %s491_s15 = scalar_lea.hbm %s681_s0, 128 }
  0x15   :  { %p492_p8 = scmp.ne.s32.totalorder %s681_s0, %s491_s15  ;;  %p495_p9 = scmp.lt.u32.totalorder %s491_s15, %s681_s0 }
  0x17   :  { %p497_p10 = pnand %p495_p9, %p492_p8 }
  0x19   :  { %500 = shalt.err (!%p497_p10)
}
  0x1a   :  { %s501_s20 = scalar_lea.vmem %s608_s24, 128  ;;  %p506_p12 = scmp.lt.s32.totalorder %s608_s24, %s608_s24 }
  0x1b   :  { %p502_p11 = scmp.ne.s32.totalorder %s608_s24, %s501_s20  ;;  %p507_p13 = scmp.lt.s32.totalorder %s501_s20, %s501_s20 }
  0x1d   :  { %p508_p0 = por %p507_p13, %p506_p12 }
  0x1f   :  { %p509_p1 = pnand %p508_p0, %p502_p11 }
  0x21   :  { %512 = shalt.err (!%p509_p1)
}
  0x22   :  { %25 = dma.hbm_to_vmem [thread:$0]  %s681_s0, 128, %s608_s24, [#allocation4], %s565_s9, %s565_s9, %s566_s10  }
  0x23   :  { %s567_s22 = smov [#allocation8]   ;;  %s513_s27 = scalar_lea.hbm %s684_s3, 1024 }
  0x24   :  { %s45_s23 = sshll.u32 %s567_s22, 4  ;;  %p514_p2 = scmp.ne.s32.totalorder %s684_s3, %s513_s27  ;;  %s46_s23 = int_to_ptr.vmem [resolvable:$true] %s45_s23 }
  0x25   :  { %p517_p3 = scmp.lt.u32.totalorder %s513_s27, %s684_s3 }
  0x27   :  { %p519_p4 = pnand %p517_p3, %p514_p2 }
  0x29   :  { %522 = shalt.err (!%p519_p4)
}
  0x2a   :  { %s523_s8 = scalar_lea.vmem %s46_s23, 1024  ;;  %p528_p6 = scmp.lt.s32.totalorder %s46_s23, %s46_s23 }
  0x2b   :  { %p524_p5 = scmp.ne.s32.totalorder %s46_s23, %s523_s8  ;;  %p529_p7 = scmp.lt.s32.totalorder %s523_s8, %s523_s8 }
  0x2d   :  { %p530_p8 = por %p529_p7, %p528_p6 }
  0x2f   :  { %p531_p9 = pnand %p530_p8, %p524_p5 }
  0x31   :  { %534 = shalt.err (!%p531_p9)
}
  0x32   :  { %51 = dma.hbm_to_vmem [thread:$0]  %s684_s3, 1024, %s46_s23, [#allocation7], %s565_s9, %s565_s9, %s566_s10  }
  0x33   :  { %557 = dma.done.wait [#allocation4], 128  }
  0x34   :  { %558 = vsyncadd [#allocation4], 4294967168 }
  0x35   :  { %559 = dma.done.wait [#allocation7], 2048  }
  0x36   :  { %560 = vsyncadd [#allocation7], 4294965248  ;;  %v568_v0 = vmov 0.0   ;;  %vm569_vm0 = vmmov 0   ;;  %v444_v1 = vld [vmem:[#allocation6] sm:$0xff]   ;;  %v445_v2 = vld [vmem:[#allocation6 + $0x8] sm:$0xff]  }
  0x37   :  { %394 = vmatprep.subr.bf16.mxu0 %v568_v0  ;;  %410 = vmatprep.mubr.msk.bf16.mxu0 %vm569_vm0, %v568_v0  ;;  %v446_v3 = vld [vmem:[#allocation6 + $0x10] sm:$0xff]   ;;  %v453_v4 = vld [vmem:[#allocation8] sm:$0xff]   ;;  %v447_v5 = vld [vmem:[#allocation6 + $0x18] sm:$0xff]  }
  0x38   :  { %414 = vmatprep.subr.bf16.mxu1 %v568_v0  ;;  %430 = vmatprep.mubr.msk.bf16.mxu1 %vm569_vm0, %v568_v0  ;;  %v454_v6 = vld [vmem:[#allocation8 + $0x8] sm:$0xff]   ;;  %v448_v7 = vld [vmem:[#allocation6 + $0x20] sm:$0xff]   ;;  %v455_v8 = vld [vmem:[#allocation8 + $0x10] sm:$0xff]  }
  0x39   :  { %395 = vmatpush3.bf16.msra.mxu0 %v444_v1  ;;  %415 = vmatpush3.bf16.msra.mxu1 %v453_v4  ;;  %v449_v9 = vld [vmem:[#allocation6 + $0x28] sm:$0xff]   ;;  %v456_v10 = vld [vmem:[#allocation8 + $0x18] sm:$0xff]   ;;  %v450_v11 = vld [vmem:[#allocation6 + $0x30] sm:$0xff]  }
  0x3a   :  { %396 = vmatprep.subr.bf16.mxu0 %v568_v0  ;;  %416 = vmatprep.subr.bf16.mxu1 %v568_v0  ;;  %v457_v12 = vld [vmem:[#allocation8 + $0x20] sm:$0xff]   ;;  %v451_v13 = vld [vmem:[#allocation6 + $0x38] sm:$0xff]   ;;  %v458_v14 = vld [vmem:[#allocation8 + $0x28] sm:$0xff]  }
  0x3b   :  { %v452_v15 = vld [vmem:[#allocation3] sm:$0xff]   ;;  %v459_v16 = vld [vmem:[#allocation8 + $0x30] sm:$0xff]  }
  0x3c   :  { %v460_v17 = vld [vmem:[#allocation8 + $0x38] sm:$0xff]  }
  0x3d   :  { %397 = vmatpush3.bf16.msra.mxu0 %v445_v2  ;;  %417 = vmatpush3.bf16.msra.mxu1 %v454_v6  ;;  %v356_v18 = vld [vmem:[%s683_s2] ss:$0 sm:$0xff]  ;;  %s570_s2 = smov [#allocation9]  }
  0x3e   :  { %398 = vmatprep.subr.bf16.mxu0 %v568_v0  ;;  %418 = vmatprep.subr.bf16.mxu1 %v568_v0  ;;  %v366_v28 = vld [vmem:[%s685_s4] ss:$0 sm:$0xff]  ;;  %s343_s4 = sshll.u32 %s570_s2, 4  ;;  %s344_s4 = int_to_ptr.vmem [resolvable:$true] %s343_s4 }
  0x3f   :  { %v375_v30 = vld [vmem:[%s686_s5] ss:$0 sm:$0xff]  ;;  %s535_s5 = scalar_lea.vmem %s344_s4, 256  ;;  %p540_p11 = scmp.lt.s32.totalorder %s344_s4, %s344_s4 }
  0x40   :  { %p536_p10 = scmp.ne.s32.totalorder %s344_s4, %s535_s5  ;;  %p541_p12 = scmp.lt.s32.totalorder %s535_s5, %s535_s5 }
  0x41   :  { %399 = vmatpush3.bf16.msra.mxu0 %v446_v3  ;;  %419 = vmatpush3.bf16.msra.mxu1 %v455_v8 }
  0x42   :  { %400 = vmatprep.subr.bf16.mxu0 %v568_v0  ;;  %420 = vmatprep.subr.bf16.mxu1 %v568_v0  ;;  %p542_p13 = por %p541_p12, %p540_p11 }
  0x44   :  { %p543_p0 = pnand %p542_p13, %p536_p10 }
  0x45   :  { %401 = vmatpush3.bf16.msra.mxu0 %v447_v5  ;;  %421 = vmatpush3.bf16.msra.mxu1 %v456_v10 }
  0x46   :  { %402 = vmatprep.subr.bf16.mxu0 %v568_v0  ;;  %422 = vmatprep.subr.bf16.mxu1 %v568_v0 }
  0x49   :  { %403 = vmatpush3.bf16.msra.mxu0 %v448_v7  ;;  %423 = vmatpush3.bf16.msra.mxu1 %v457_v12 }
  0x4a   :  { %404 = vmatprep.subr.bf16.mxu0 %v568_v0  ;;  %424 = vmatprep.subr.bf16.mxu1 %v568_v0 }
  0x4d   :  { %405 = vmatpush3.bf16.msra.mxu0 %v449_v9  ;;  %425 = vmatpush3.bf16.msra.mxu1 %v458_v14 }
  0x4e   :  { %406 = vmatprep.subr.bf16.mxu0 %v568_v0  ;;  %426 = vmatprep.subr.bf16.mxu1 %v568_v0 }
  0x51   :  { %407 = vmatpush3.bf16.msra.mxu0 %v450_v11  ;;  %427 = vmatpush3.bf16.msra.mxu1 %v459_v16 }
  0x52   :  { %408 = vmatprep.subr.bf16.mxu0 %v568_v0  ;;  %428 = vmatprep.subr.bf16.mxu1 %v568_v0 }
  0x55   :  { %409 = vmatpush3.bf16.msra.mxu0 %v451_v13  ;;  %429 = vmatpush3.bf16.msra.mxu1 %v460_v17 }
  0x58   :  { %411 = vmatmul.mubr.bf16.vlgmr.msra.gmra.mrb[0].mxu0 %v452_v15 }
 0x12b   :  { %v183_v19 = vpop.f32.mrb[0].mxu0 }
 0x12c   :  { %v184_v20 = vadd.f32 %v356_v18, %v183_v19  ;;  %v412_v21 = vpop.f32.mrb[1].mxu0 }
 0x12d   :  { %v186_v22 = vpop.f32.mrb[2].mxu0 }
 0x12e   :  { %v187_v23 = vadd.f32 %v356_v18, %v186_v22  ;;  %v413_v24 = vpop.f32.mrb[3].mxu0  ;;  %v190_v25 = vmax.f32 %v184_v20, 0.0 }
 0x130   :  { %v191_v26 = vmax.f32 %v187_v23, 0.0 }
 0x132   :  { %v196_v27 = vpack.c.bf16 %v191_v26, %v190_v25 }
 0x134   :  { %431 = vmatmul.mubr.bf16.vlgmr.msra.gmra.mrb[0].mxu1 %v196_v27 }
 0x207   :  { %v302_v29 = vpop.f32.mrb[0].mxu1 }
 0x208   :  { %v303_v31 = vadd.f32 %v366_v28, %v302_v29  ;;  %v432_v32 = vpop.f32.mrb[1].mxu1 }
 0x209   :  { %v305_v33 = vpop.f32.mrb[2].mxu1 }
 0x20a   :  { %v306_v34 = vadd.f32 %v366_v28, %v305_v33  ;;  %v433_v35 = vpop.f32.mrb[3].mxu1  ;;  %v316_v36 = vadd.f32 %v375_v30, %v303_v31 }
 0x20c   :  { %318 = vmax.xlane.f32.xlu0 %v316_v36  ;;  %v317_v37 = vadd.f32 %v375_v30, %v306_v34 }
 0x210   :  { %320 = vmax.xlane.f32.xlu0 %v317_v37 }
 0x299   :  { %v319_v38 = vpop.xlane.xlu0 %318 }
 0x29a   :  { %v322_v39 = vsub.f32 %v316_v36, %v319_v38 }
 0x29c   :  { %v324_v40 = vmul.f32 1.442695, %v322_v39 }
 0x29d   :  { %v321_v41 = vpop.xlane.xlu0 %320 }
 0x29e   :  { %461 = vpow2.f32 %v324_v40  ;;  %v323_v42 = vsub.f32 %v317_v37, %v321_v41 }
 0x2a0   :  { %v326_v43 = vmul.f32 1.442695, %v323_v42 }
 0x2a2   :  { %463 = vpow2.f32 %v326_v43 }
 0x2a8   :  { %v462_v44 = vpop.eup %461 }
 0x2a9   :  { %328 = vadd.xlane.f32.xlu1 %v462_v44 }
 0x2ac   :  { %v464_v45 = vpop.eup %463 }
 0x2ad   :  { %330 = vadd.xlane.f32.xlu1 %v464_v45 }
 0x336   :  { %v329_v46 = vpop.xlane.xlu1 %328 }
 0x337   :  { %465 = vrcp.f32 %v329_v46 }
 0x33a   :  { %v331_v47 = vpop.xlane.xlu1 %330 }
 0x33b   :  { %467 = vrcp.f32 %v331_v47 }
 0x341   :  { %v466_v48 = vpop.eup %465 }
 0x342   :  { %v333_v49 = vmul.f32 %v466_v48, %v462_v44 }
 0x344   :  { %336 = vst [vmem:[#allocation9] sm:$0xff] %v333_v49 }
 0x345   :  { %v468_v50 = vpop.eup %467 }
 0x346   :  { %v335_v51 = vmul.f32 %v468_v50, %v464_v45 }
 0x348   :  { %337 = vst [vmem:[#allocation9 + $0x8] sm:$0xff] %v335_v51 }
 0x349   :  { %546 = shalt.err (!%p543_p0)
}
 0x34a   :  { %s547_s16 = scalar_lea.hbm %s687_s6, 256 }
 0x34b   :  { %p548_p1 = scmp.ne.s32.totalorder %s687_s6, %s547_s16  ;;  %p551_p2 = scmp.lt.u32.totalorder %s547_s16, %s687_s6 }
 0x34d   :  { %p553_p3 = pnand %p551_p2, %p548_p1 }
 0x34f   :  { %556 = shalt.err (!%p553_p3)
}
 0x350   :  { %s571_s1 = smov 128   ;;  %s572_s21 = smov 8  }
 0x351   :  { %349 = dma.vmem_to_hbm [thread:$0]  %s344_s4, 256, %s687_s6, [#allocation5], %s571_s1, %s571_s1, %s572_s21  }
 0x352   :  { %561 = dma.done.wait [#allocation5], 256  }
 0x353   :  { %562 = vsyncadd [#allocation5], 4294967040 }
 0x354   :  { %353 = vsyncpa [#allocation4], 1 }
 0x355   :  { %354 = vsyncpa [#allocation7], 1 }
 0x356   :  { %355 = vsyncpa [#allocation5], 1 }

// kernel: tpu_custom_call.1
= control target key start
LH: loop header
LB: loop body
LE: loop exit
PB: predicated region body
PF: predicated region fallthrough
CT: control target
= control target key end

     0   :  { %11 = vsyncpa [#allocation4], 0  ;;  %s681_s0 = inlined_call_operand.hbm [shape: bf16[16,128], index: 0, kind: input, shape index: {}]   ;;  %s682_s1 = inlined_call_operand.hbm [shape: bf16[128,128], index: 1, kind: input, shape index: {}]   ;;  %s683_s2 = inlined_call_operand.vmem [shape: f32[1,128], index: 2, kind: input, shape index: {}]   ;;  %s684_s3 = inlined_call_operand.hbm [shape: bf16[128,128], index: 3, kind: input, shape index: {}]   ;;  %s685_s4 = inlined_call_operand.vmem [shape: f32[1,128], index: 4, kind: input, shape index: {}]   ;;  %s686_s5 = inlined_call_operand.vmem [shape: f32[1,128], index: 5, kind: input, shape index: {}]   ;;  %s687_s6 = inlined_call_operand.hbm [shape: f32[16,128], index: 6, kind: output, shape index: {}]  }
   0x1   :  { %12 = vsyncpa [#allocation7], 0 }
   0x2   :  { %13 = vsyncpa [#allocation5], 0  ;;  %s563_s21 = smov [#allocation6]   ;;  %s564_s23 = smov [#allocation3]  }
   0x3   :  { %s31_s22 = sshll.u32 %s563_s21, 4  ;;  %s19_s24 = sshll.u32 %s564_s23, 4  ;;  %s32_s22 = int_to_ptr.vmem [resolvable:$true] %s31_s22  ;;  %s608_s24 = int_to_ptr.vmem [resolvable:$true] %s19_s24 }
   0x4   :  { %s469_s27 = scalar_lea.hbm %s682_s1, 1024 }
   0x5   :  { %p470_p0 = scmp.ne.s32.totalorder %s682_s1, %s469_s27  ;;  %p473_p1 = scmp.lt.u32.totalorder %s469_s27, %s682_s1 }
   0x7   :  { %p475_p2 = pnand %p473_p1, %p470_p0 }
   0x9   :  { %478 = shalt.err (!%p475_p2)
}
   0xa   :  { %s479_s8 = scalar_lea.vmem %s32_s22, 1024  ;;  %p484_p4 = scmp.lt.s32.totalorder %s32_s22, %s32_s22 }
   0xb   :  { %p480_p3 = scmp.ne.s32.totalorder %s32_s22, %s479_s8  ;;  %p485_p5 = scmp.lt.s32.totalorder %s479_s8, %s479_s8 }
   0xd   :  { %p486_p6 = por %p485_p5, %p484_p4 }
   0xf   :  { %p487_p7 = pnand %p486_p6, %p480_p3 }
  0x11   :  { %490 = shalt.err (!%p487_p7)
}
  0x12   :  { %s565_s9 = smov 64   ;;  %s566_s10 = smov 4  }
  0x13   :  { %37 = dma.hbm_to_vmem [thread:$0]  %s682_s1, 1024, %s32_s22, [#allocation7], %s565_s9, %s565_s9, %s566_s10  }
  0x14   :  { %s491_s15 = scalar_lea.hbm %s681_s0, 128 }
  0x15   :  { %p492_p8 = scmp.ne.s32.totalorder %s681_s0, %s491_s15  ;;  %p495_p9 = scmp.lt.u32.totalorder %s491_s15, %s681_s0 }
  0x17   :  { %p497_p10 = pnand %p495_p9, %p492_p8 }
  0x19   :  { %500 = shalt.err (!%p497_p10)
}
  0x1a   :  { %s501_s20 = scalar_lea.vmem %s608_s24, 128  ;;  %p506_p12 = scmp.lt.s32.totalorder %s608_s24, %s608_s24 }
  0x1b   :  { %p502_p11 = scmp.ne.s32.totalorder %s608_s24, %s501_s20  ;;  %p507_p13 = scmp.lt.s32.totalorder %s501_s20, %s501_s20 }
  0x1d   :  { %p508_p0 = por %p507_p13, %p506_p12 }
  0x1f   :  { %p509_p1 = pnand %p508_p0, %p502_p11 }
  0x21   :  { %512 = shalt.err (!%p509_p1)
}
  0x22   :  { %25 = dma.hbm_to_vmem [thread:$0]  %s681_s0, 128, %s608_s24, [#allocation4], %s565_s9, %s565_s9, %s566_s10  }
  0x23   :  { %s567_s22 = smov [#allocation8]   ;;  %s513_s27 = scalar_lea.hbm %s684_s3, 1024 }
  0x24   :  { %s45_s23 = sshll.u32 %s567_s22, 4  ;;  %p514_p2 = scmp.ne.s32.totalorder %s684_s3, %s513_s27  ;;  %s46_s23 = int_to_ptr.vmem [resolvable:$true] %s45_s23 }
  0x25   :  { %p517_p3 = scmp.lt.u32.totalorder %s513_s27, %s684_s3 }
  0x27   :  { %p519_p4 = pnand %p517_p3, %p514_p2 }
  0x29   :  { %522 = shalt.err (!%p519_p4)
}
  0x2a   :  { %s523_s8 = scalar_lea.vmem %s46_s23, 1024  ;;  %p528_p6 = scmp.lt.s32.totalorder %s46_s23, %s46_s23 }
  0x2b   :  { %p524_p5 = scmp.ne.s32.totalorder %s46_s23, %s523_s8  ;;  %p529_p7 = scmp.lt.s32.totalorder %s523_s8, %s523_s8 }
  0x2d   :  { %p530_p8 = por %p529_p7, %p528_p6 }
  0x2f   :  { %p531_p9 = pnand %p530_p8, %p524_p5 }
  0x31   :  { %534 = shalt.err (!%p531_p9)
}
  0x32   :  { %51 = dma.hbm_to_vmem [thread:$0]  %s684_s3, 1024, %s46_s23, [#allocation7], %s565_s9, %s565_s9, %s566_s10  }
  0x33   :  { %557 = dma.done.wait [#allocation4], 128  }
  0x34   :  { %558 = vsyncadd [#allocation4], 4294967168 }
  0x35   :  { %559 = dma.done.wait [#allocation7], 2048  }
  0x36   :  { %560 = vsyncadd [#allocation7], 4294965248  ;;  %v568_v0 = vmov 0.0   ;;  %vm569_vm0 = vmmov 0   ;;  %v444_v1 = vld [vmem:[#allocation6] sm:$0xff]   ;;  %v445_v2 = vld [vmem:[#allocation6 + $0x8] sm:$0xff]  }
  0x37   :  { %394 = vmatprep.subr.bf16.mxu0 %v568_v0  ;;  %410 = vmatprep.mubr.msk.bf16.mxu0 %vm569_vm0, %v568_v0  ;;  %v446_v3 = vld [vmem:[#allocation6 + $0x10] sm:$0xff]   ;;  %v453_v4 = vld [vmem:[#allocation8] sm:$0xff]   ;;  %v447_v5 = vld [vmem:[#allocation6 + $0x18] sm:$0xff]  }
  0x38   :  { %414 = vmatprep.subr.bf16.mxu1 %v568_v0  ;;  %430 = vmatprep.mubr.msk.bf16.mxu1 %vm569_vm0, %v568_v0  ;;  %v454_v6 = vld [vmem:[#allocation8 + $0x8] sm:$0xff]   ;;  %v448_v7 = vld [vmem:[#allocation6 + $0x20] sm:$0xff]   ;;  %v455_v8 = vld [vmem:[#allocation8 + $0x10] sm:$0xff]  }
  0x39   :  { %395 = vmatpush3.bf16.msra.mxu0 %v444_v1  ;;  %415 = vmatpush3.bf16.msra.mxu1 %v453_v4  ;;  %v449_v9 = vld [vmem:[#allocation6 + $0x28] sm:$0xff]   ;;  %v456_v10 = vld [vmem:[#allocation8 + $0x18] sm:$0xff]   ;;  %v450_v11 = vld [vmem:[#allocation6 + $0x30] sm:$0xff]  }
  0x3a   :  { %396 = vmatprep.subr.bf16.mxu0 %v568_v0  ;;  %416 = vmatprep.subr.bf16.mxu1 %v568_v0  ;;  %v457_v12 = vld [vmem:[#allocation8 + $0x20] sm:$0xff]   ;;  %v451_v13 = vld [vmem:[#allocation6 + $0x38] sm:$0xff]   ;;  %v458_v14 = vld [vmem:[#allocation8 + $0x28] sm:$0xff]  }
  0x3b   :  { %v452_v15 = vld [vmem:[#allocation3] sm:$0xff]   ;;  %v459_v16 = vld [vmem:[#allocation8 + $0x30] sm:$0xff]  }
  0x3c   :  { %v460_v17 = vld [vmem:[#allocation8 + $0x38] sm:$0xff]  }
  0x3d   :  { %397 = vmatpush3.bf16.msra.mxu0 %v445_v2  ;;  %417 = vmatpush3.bf16.msra.mxu1 %v454_v6  ;;  %v356_v18 = vld [vmem:[%s683_s2] ss:$0 sm:$0xff]  ;;  %s570_s2 = smov [#allocation9]  }
  0x3e   :  { %398 = vmatprep.subr.bf16.mxu0 %v568_v0  ;;  %418 = vmatprep.subr.bf16.mxu1 %v568_v0  ;;  %v366_v28 = vld [vmem:[%s685_s4] ss:$0 sm:$0xff]  ;;  %s343_s4 = sshll.u32 %s570_s2, 4  ;;  %s344_s4 = int_to_ptr.vmem [resolvable:$true] %s343_s4 }
  0x3f   :  { %v375_v30 = vld [vmem:[%s686_s5] ss:$0 sm:$0xff]  ;;  %s535_s5 = scalar_lea.vmem %s344_s4, 256  ;;  %p540_p11 = scmp.lt.s32.totalorder %s344_s4, %s344_s4 }
  0x40   :  { %p536_p10 = scmp.ne.s32.totalorder %s344_s4, %s535_s5  ;;  %p541_p12 = scmp.lt.s32.totalorder %s535_s5, %s535_s5 }
  0x41   :  { %399 = vmatpush3.bf16.msra.mxu0 %v446_v3  ;;  %419 = vmatpush3.bf16.msra.mxu1 %v455_v8 }
  0x42   :  { %400 = vmatprep.subr.bf16.mxu0 %v568_v0  ;;  %420 = vmatprep.subr.bf16.mxu1 %v568_v0  ;;  %p542_p13 = por %p541_p12, %p540_p11 }
  0x44   :  { %p543_p0 = pnand %p542_p13, %p536_p10 }
  0x45   :  { %401 = vmatpush3.bf16.msra.mxu0 %v447_v5  ;;  %421 = vmatpush3.bf16.msra.mxu1 %v456_v10 }
  0x46   :  { %402 = vmatprep.subr.bf16.mxu0 %v568_v0  ;;  %422 = vmatprep.subr.bf16.mxu1 %v568_v0 }
  0x49   :  { %403 = vmatpush3.bf16.msra.mxu0 %v448_v7  ;;  %423 = vmatpush3.bf16.msra.mxu1 %v457_v12 }
  0x4a   :  { %404 = vmatprep.subr.bf16.mxu0 %v568_v0  ;;  %424 = vmatprep.subr.bf16.mxu1 %v568_v0 }
  0x4d   :  { %405 = vmatpush3.bf16.msra.mxu0 %v449_v9  ;;  %425 = vmatpush3.bf16.msra.mxu1 %v458_v14 }
  0x4e   :  { %406 = vmatprep.subr.bf16.mxu0 %v568_v0  ;;  %426 = vmatprep.subr.bf16.mxu1 %v568_v0 }
  0x51   :  { %407 = vmatpush3.bf16.msra.mxu0 %v450_v11  ;;  %427 = vmatpush3.bf16.msra.mxu1 %v459_v16 }
  0x52   :  { %408 = vmatprep.subr.bf16.mxu0 %v568_v0  ;;  %428 = vmatprep.subr.bf16.mxu1 %v568_v0 }
  0x55   :  { %409 = vmatpush3.bf16.msra.mxu0 %v451_v13  ;;  %429 = vmatpush3.bf16.msra.mxu1 %v460_v17 }
  0x58   :  { %411 = vmatmul.mubr.bf16.vlgmr.msra.gmra.mrb[0].mxu0 %v452_v15 }
 0x12b   :  { %v183_v19 = vpop.f32.mrb[0].mxu0 }
 0x12c   :  { %v184_v20 = vadd.f32 %v356_v18, %v183_v19  ;;  %v412_v21 = vpop.f32.mrb[1].mxu0 }
 0x12d   :  { %v186_v22 = vpop.f32.mrb[2].mxu0 }
 0x12e   :  { %v187_v23 = vadd.f32 %v356_v18, %v186_v22  ;;  %v413_v24 = vpop.f32.mrb[3].mxu0  ;;  %v190_v25 = vmax.f32 %v184_v20, 0.0 }
 0x130   :  { %v191_v26 = vmax.f32 %v187_v23, 0.0 }
 0x132   :  { %v196_v27 = vpack.c.bf16 %v191_v26, %v190_v25 }
 0x134   :  { %431 = vmatmul.mubr.bf16.vlgmr.msra.gmra.mrb[0].mxu1 %v196_v27 }
 0x207   :  { %v302_v29 = vpop.f32.mrb[0].mxu1 }
 0x208   :  { %v303_v31 = vadd.f32 %v366_v28, %v302_v29  ;;  %v432_v32 = vpop.f32.mrb[1].mxu1 }
 0x209   :  { %v305_v33 = vpop.f32.mrb[2].mxu1 }
 0x20a   :  { %v306_v34 = vadd.f32 %v366_v28, %v305_v33  ;;  %v433_v35 = vpop.f32.mrb[3].mxu1  ;;  %v316_v36 = vadd.f32 %v375_v30, %v303_v31 }
 0x20c   :  { %318 = vmax.xlane.f32.xlu0 %v316_v36  ;;  %v317_v37 = vadd.f32 %v375_v30, %v306_v34 }
 0x210   :  { %320 = vmax.xlane.f32.xlu0 %v317_v37 }
 0x299   :  { %v319_v38 = vpop.xlane.xlu0 %318 }
 0x29a   :  { %v322_v39 = vsub.f32 %v316_v36, %v319_v38 }
 0x29c   :  { %v324_v40 = vmul.f32 1.442695, %v322_v39 }
 0x29d   :  { %v321_v41 = vpop.xlane.xlu0 %320 }
 0x29e   :  { %461 = vpow2.f32 %v324_v40  ;;  %v323_v42 = vsub.f32 %v317_v37, %v321_v41 }
 0x2a0   :  { %v326_v43 = vmul.f32 1.442695, %v323_v42 }
 0x2a2   :  { %463 = vpow2.f32 %v326_v43 }
 0x2a8   :  { %v462_v44 = vpop.eup %461 }
 0x2a9   :  { %328 = vadd.xlane.f32.xlu1 %v462_v44 }
 0x2ac   :  { %v464_v45 = vpop.eup %463 }
 0x2ad   :  { %330 = vadd.xlane.f32.xlu1 %v464_v45 }
 0x336   :  { %v329_v46 = vpop.xlane.xlu1 %328 }
 0x337   :  { %465 = vrcp.f32 %v329_v46 }
 0x33a   :  { %v331_v47 = vpop.xlane.xlu1 %330 }
 0x33b   :  { %467 = vrcp.f32 %v331_v47 }
 0x341   :  { %v466_v48 = vpop.eup %465 }
 0x342   :  { %v333_v49 = vmul.f32 %v466_v48, %v462_v44 }
 0x344   :  { %336 = vst [vmem:[#allocation9] sm:$0xff] %v333_v49 }
 0x345   :  { %v468_v50 = vpop.eup %467 }
 0x346   :  { %v335_v51 = vmul.f32 %v468_v50, %v464_v45 }
 0x348   :  { %337 = vst [vmem:[#allocation9 + $0x8] sm:$0xff] %v335_v51 }
 0x349   :  { %546 = shalt.err (!%p543_p0)
}
 0x34a   :  { %s547_s16 = scalar_lea.hbm %s687_s6, 256 }
 0x34b   :  { %p548_p1 = scmp.ne.s32.totalorder %s687_s6, %s547_s16  ;;  %p551_p2 = scmp.lt.u32.totalorder %s547_s16, %s687_s6 }
 0x34d   :  { %p553_p3 = pnand %p551_p2, %p548_p1 }
 0x34f   :  { %556 = shalt.err (!%p553_p3)
}
 0x350   :  { %s571_s1 = smov 128   ;;  %s572_s21 = smov 8  }
 0x351   :  { %349 = dma.vmem_to_hbm [thread:$0]  %s344_s4, 256, %s687_s6, [#allocation5], %s571_s1, %s571_s1, %s572_s21  }
 0x352   :  { %561 = dma.done.wait [#allocation5], 256  }
 0x353   :  { %562 = vsyncadd [#allocation5], 4294967040 }
 0x354   :  { %353 = vsyncpa [#allocation4], 1 }
 0x355   :  { %354 = vsyncpa [#allocation7], 1 }
 0x356   :  { %355 = vsyncpa [#allocation5], 1 }

</bundles_post_ra>
